<compile_context>
chip_gen: v6e
topology: v6e:2x2x1
jax: 0.10.0
libtpu: 0.0.40
codegen_flags: <defaults>
</compile_context>

<pallas_src>
import functools

import jax
import jax.numpy as jnp
from jax.experimental import pallas as pl
from jax.experimental.pallas import tpu as pltpu


def _maxpool_kernel(x_ref, o_ref, t_ref, *, k, p, h, out_h, out_w,
                    n_top, ob_start, w_sc, w_copy):
    """Pools one (batch, channel-block) NCHW plane.

    x_ref : (cb, H, W)          input block (W on lanes)
    o_ref : (cb, out_h, out_w)  pooled output block (NCHW layout)
    t_ref : (cb, W_sc, out_h)   VMEM scratch: H-reduced intermediate,
                                transposed so the padded W rides the sublanes.
    """
    cb = x_ref.shape[0]
    dt = x_ref.dtype

    # ---- stage 1: max over the H window (sublane axis), no padded copy -----
    def border_row(oh):
        # One output row whose window sticks out of [0, H): max of the valid
        # taps, clamped at the zero pad value.
        acc = None
        clamp = False
        for di in range(k):
            r = 2 * oh + di - p
            if 0 <= r < h:
                tap = x_ref[:, pl.ds(r, 1), :]            # (cb, 1, W)
                acc = tap if acc is None else jnp.maximum(acc, tap)
            else:
                clamp = True
        if clamp:
            acc = jnp.maximum(acc, jnp.zeros_like(acc))
        return acc

    pieces = [border_row(oh) for oh in range(n_top)]

    n_int = ob_start - n_top
    if n_int > 0:
        start0 = 2 * n_top - p                            # always >= 0
        acc = x_ref[:, pl.ds(start0, n_int, stride=2), :]
        for di in range(1, k):
            acc = jnp.maximum(
                acc, x_ref[:, pl.ds(start0 + di, n_int, stride=2), :])
        pieces.append(acc)

    pieces += [border_row(oh) for oh in range(ob_start, out_h)]

    colmax = pieces[0] if len(pieces) == 1 else jnp.concatenate(pieces, axis=1)
    # colmax: (cb, out_h, W)

    # ---- stage 2: put the (zero-padded) W axis on the sublanes --------------
    # Only the tiny p-wide border strips are zeroed; the interior is the
    # transposed H-reduced intermediate (minor-dim transpose -> idle XLU).
    t_ref[:, p:p + w_copy, :] = jnp.transpose(colmax[:, :, :w_copy], (0, 2, 1))
    if p > 0:
        t_ref[:, :p, :] = jnp.zeros((cb, p, out_h), dt)
    if p + w_copy < w_sc:
        t_ref[:, p + w_copy:, :] = jnp.zeros((cb, w_sc - p - w_copy, out_h), dt)

    # ---- stage 3: max over the W window (stride-2 sublane reads) ------------
    rmax = t_ref[:, pl.ds(0, out_w, stride=2), :]
    for dj in range(1, k):
        rmax = jnp.maximum(rmax, t_ref[:, pl.ds(dj, out_w, stride=2), :])
    # rmax: (cb, out_w, out_h)

    # ---- stage 4: transpose back and store NCHW ------------------------------
    o_ref[...] = jnp.transpose(rmax, (0, 2, 1))


def _vmem_capacity_bytes():
    try:
        cap = getattr(pltpu.get_tpu_info(), "vmem_capacity_bytes", None)
        if cap:
            return int(cap)
    except Exception:
        pass
    return 64 << 20   # conservative default (v7x per-core VMEM)


def maxpool(x, kernel_size):
    """NCHW maxpool matching the PyTorch module's forward."""
    n, c, h, w = x.shape
    k = int(kernel_size)
    p = (k - 1) // 2
    out_h = (h + 2 * p - k) // 2 + 1
    out_w = (w + 2 * p - k) // 2 + 1
    assert out_h >= 1 and out_w >= 1, "degenerate pooling shape"

    # Static H-window classification: rows whose window pokes above row 0 or
    # below row H-1 get the zero-clamp fixup; everything in between is the
    # plain k-tap stride-2 max taken directly from x_ref.
    n_top = min(out_h, (p + 1) // 2)
    oh_b = (h + p - k + 2) // 2            # ceil((h + p - k + 1) / 2)
    ob_start = min(out_h, max(n_top, oh_b))

    # Padded-W extent any window can touch, and how many real columns land there.
    w_sc = 2 * out_w + k - 2
    w_copy = min(w, w_sc - p)

    itemsize = jnp.dtype(x.dtype).itemsize
    # Per-channel VMEM bytes: double-buffered in/out blocks + transposed
    # scratch + value temporaries (colmax, rmax).
    per_ch = itemsize * (2 * h * w + 2 * out_h * out_w
                         + w_sc * out_h + out_h * w + out_w * out_h)
    cap = _vmem_capacity_bytes()
    budget = int(cap * 0.35)               # generation-aware block budget
    cb = 1
    for d in range(c, 0, -1):
        if c % d == 0 and d * per_ch <= budget:
            cb = d
            break
    # TODO(synk): if even cb == 1 exceeds the budget (very large H*W planes),
    # also tile H with a k-wide halo; not needed for the shapes this module sees.
    # TODO(synk): for narrow channel blocks one could fold a factor of W into
    # the lane axis (cross-half max via pltpu.roll) for better lane density.

    vmem_limit = int(min(cap * 0.9, max(cap * 0.75, 1.5 * cb * per_ch)))

    kernel = functools.partial(
        _maxpool_kernel, k=k, p=p, h=h, out_h=out_h, out_w=out_w,
        n_top=n_top, ob_start=ob_start, w_sc=w_sc, w_copy=w_copy)

    return pl.pallas_call(
        kernel,
        out_shape=jax.ShapeDtypeStruct((n, c, out_h, out_w), x.dtype),
        grid=(n, c // cb),
        in_specs=[pl.BlockSpec((None, cb, h, w), lambda i, j: (i, j, 0, 0))],
        out_specs=pl.BlockSpec((None, cb, out_h, out_w),
                               lambda i, j: (i, j, 0, 0)),
        scratch_shapes=[pltpu.VMEM((cb, w_sc, out_h), x.dtype)],
        compiler_params=pltpu.CompilerParams(
            dimension_semantics=("parallel", "parallel"),
            vmem_limit_bytes=vmem_limit,
        ),
    )(x)


def _reference_maxpool(x, kernel_size):
    """Pure-JAX reference identical to the PyTorch forward (for verification)."""
    p = (kernel_size - 1) // 2
    xp = jnp.pad(x, ((0, 0), (0, 0), (p, p), (p, p)), mode="constant")
    h_pad, w_pad = xp.shape[2], xp.shape[3]
    out_h = (h_pad - kernel_size) // 2 + 1
    out_w = (w_pad - kernel_size) // 2 + 1
    acc = None
    for di in range(kernel_size):
        for dj in range(kernel_size):
            win = xp[:, :, di:di + 2 * (out_h - 1) + 1:2,
                         dj:dj + 2 * (out_w - 1) + 1:2]
            acc = win if acc is None else jnp.maximum(acc, win)
    return acc


if __name__ == "__main__":
    pooled = jax.jit(maxpool, static_argnums=1)
    key = jax.random.PRNGKey(0)
    k1, k2, k3 = jax.random.split(key, 3)

    # primary shape (NCHW), kernel_size=3 as used by the module
    x = jax.random.normal(k1, (2, 4, 16, 16), dtype=jnp.float32)
    y = jax.block_until_ready(pooled(x, 3))
    assert y.shape == (2, 4, 8, 8), y.shape
    assert jnp.allclose(y, _reference_maxpool(x, 3)), "mismatch (16x16, k=3)"

    # odd spatial dims
    x2 = jax.random.normal(k2, (1, 3, 13, 11), dtype=jnp.float32)
    y2 = jax.block_until_ready(pooled(x2, 3))
    assert jnp.allclose(y2, _reference_maxpool(x2, 3)), "mismatch (13x11, k=3)"

    # larger window
    x3 = jax.random.normal(k3, (2, 4, 15, 16), dtype=jnp.float32)
    y3 = jax.block_until_ready(pooled(x3, 5))
    assert jnp.allclose(y3, _reference_maxpool(x3, 5)), "mismatch (15x16, k=5)"

    print("KERNEL_OK")
</pallas_src>

<mosaic_0001>
module attributes {stable_mosaic.version = 11 : i64} {
  func.func @_maxpool_kernel(%arg0: i32, %arg1: i32, %arg2: memref<1x4x16x16xf32, #tpu.memory_space<vmem>>, %arg3: memref<1x4x8x8xf32, #tpu.memory_space<vmem>>, %arg4: memref<4x17x8xf32, #tpu.memory_space<vmem>>) attributes {dimension_semantics = [#tpu.dimension_semantics<parallel>, #tpu.dimension_semantics<parallel>], iteration_bounds = array<i64: 2, 1>, scalar_prefetch = 0 : i64, scratch_operands = 1 : i64, tpu.core_type = #tpu.core_type<tc>, window_params = [{transform_indices = @transform_0, window_bounds = array<i64: 1, 4, 16, 16>}, {transform_indices = @transform_1, window_bounds = array<i64: 1, 4, 8, 8>}]} {
    %c0 = arith.constant 0 : index
    %c0_0 = arith.constant 0 : index
    %c0_1 = arith.constant 0 : index
    %c0_2 = arith.constant 0 : index
    %0 = vector.load %arg2[%c0, %c0_0, %c0_1, %c0_2] : memref<1x4x16x16xf32, #tpu.memory_space<vmem>>, vector<1x4x1x16xf32>
    %1 = vector.shape_cast %0 : vector<1x4x1x16xf32> to vector<4x1x16xf32>
    %c0_3 = arith.constant 0 : index
    %c0_4 = arith.constant 0 : index
    %c1 = arith.constant 1 : index
    %c0_5 = arith.constant 0 : index
    %2 = vector.load %arg2[%c0_3, %c0_4, %c1, %c0_5] : memref<1x4x16x16xf32, #tpu.memory_space<vmem>>, vector<1x4x1x16xf32>
    %3 = vector.shape_cast %2 : vector<1x4x1x16xf32> to vector<4x1x16xf32>
    %4 = arith.maximumf %1, %3 : vector<4x1x16xf32>
    %cst = arith.constant 0.000000e+00 : f32
    %5 = vector.broadcast %cst : f32 to vector<4x1x16xf32>
    %6 = arith.maximumf %4, %5 : vector<4x1x16xf32>
    %c0_6 = arith.constant 0 : index
    %c0_7 = arith.constant 0 : index
    %c1_8 = arith.constant 1 : index
    %c0_9 = arith.constant 0 : index
    %7 = tpu.strided_load %arg2[%c0_6, %c0_7, %c1_8, %c0_9] {strides = array<i32: 1, 1, 2, 1>} : memref<1x4x16x16xf32, #tpu.memory_space<vmem>>, vector<1x4x7x16xf32>
    %8 = vector.shape_cast %7 : vector<1x4x7x16xf32> to vector<4x7x16xf32>
    %c0_10 = arith.constant 0 : index
    %c0_11 = arith.constant 0 : index
    %c2 = arith.constant 2 : index
    %c0_12 = arith.constant 0 : index
    %9 = tpu.strided_load %arg2[%c0_10, %c0_11, %c2, %c0_12] {strides = array<i32: 1, 1, 2, 1>} : memref<1x4x16x16xf32, #tpu.memory_space<vmem>>, vector<1x4x7x16xf32>
    %10 = vector.shape_cast %9 : vector<1x4x7x16xf32> to vector<4x7x16xf32>
    %11 = arith.maximumf %8, %10 : vector<4x7x16xf32>
    %c0_13 = arith.constant 0 : index
    %c0_14 = arith.constant 0 : index
    %c3 = arith.constant 3 : index
    %c0_15 = arith.constant 0 : index
    %12 = tpu.strided_load %arg2[%c0_13, %c0_14, %c3, %c0_15] {strides = array<i32: 1, 1, 2, 1>} : memref<1x4x16x16xf32, #tpu.memory_space<vmem>>, vector<1x4x7x16xf32>
    %13 = vector.shape_cast %12 : vector<1x4x7x16xf32> to vector<4x7x16xf32>
    %14 = arith.maximumf %11, %13 : vector<4x7x16xf32>
    %15 = tpu.concatenate %6, %14 in 1 : vector<4x1x16xf32>, vector<4x7x16xf32> -> vector<4x8x16xf32>
    %16 = tpu.transpose %15, [0, 2, 1] : vector<4x8x16xf32> -> vector<4x16x8xf32>
    %c0_16 = arith.constant 0 : index
    %c1_17 = arith.constant 1 : index
    %c0_18 = arith.constant 0 : index
    %17 = vector.load %arg4[%c0_16, %c1_17, %c0_18] : memref<4x17x8xf32, #tpu.memory_space<vmem>>, vector<4x16x8xf32>
    tpu.vector_store %arg4[%c0_16, %c1_17, %c0_18], %16 {strides = array<i32>} : memref<4x17x8xf32, #tpu.memory_space<vmem>>, vector<4x16x8xf32>,
    %cst_19 = arith.constant 0.000000e+00 : f32
    %18 = vector.broadcast %cst_19 : f32 to vector<4x1x8xf32>
    %c0_20 = arith.constant 0 : index
    %c0_21 = arith.constant 0 : index
    %c0_22 = arith.constant 0 : index
    %19 = vector.load %arg4[%c0_20, %c0_21, %c0_22] : memref<4x17x8xf32, #tpu.memory_space<vmem>>, vector<4x1x8xf32>
    tpu.vector_store %arg4[%c0_20, %c0_21, %c0_22], %18 {strides = array<i32>} : memref<4x17x8xf32, #tpu.memory_space<vmem>>, vector<4x1x8xf32>,
    %c0_23 = arith.constant 0 : index
    %c0_24 = arith.constant 0 : index
    %c0_25 = arith.constant 0 : index
    %20 = tpu.strided_load %arg4[%c0_23, %c0_24, %c0_25] {strides = array<i32: 1, 2, 1>} : memref<4x17x8xf32, #tpu.memory_space<vmem>>, vector<4x8x8xf32>
    %c0_26 = arith.constant 0 : index
    %c1_27 = arith.constant 1 : index
    %c0_28 = arith.constant 0 : index
    %21 = tpu.strided_load %arg4[%c0_26, %c1_27, %c0_28] {strides = array<i32: 1, 2, 1>} : memref<4x17x8xf32, #tpu.memory_space<vmem>>, vector<4x8x8xf32>
    %22 = arith.maximumf %20, %21 : vector<4x8x8xf32>
    %c0_29 = arith.constant 0 : index
    %c2_30 = arith.constant 2 : index
    %c0_31 = arith.constant 0 : index
    %23 = tpu.strided_load %arg4[%c0_29, %c2_30, %c0_31] {strides = array<i32: 1, 2, 1>} : memref<4x17x8xf32, #tpu.memory_space<vmem>>, vector<4x8x8xf32>
    %24 = arith.maximumf %22, %23 : vector<4x8x8xf32>
    %25 = tpu.transpose %24, [0, 2, 1] : vector<4x8x8xf32> -> vector<4x8x8xf32>
    %c0_32 = arith.constant 0 : index
    %c0_33 = arith.constant 0 : index
    %c0_34 = arith.constant 0 : index
    %c0_35 = arith.constant 0 : index
    %26 = vector.load %arg3[%c0_32, %c0_33, %c0_34, %c0_35] : memref<1x4x8x8xf32, #tpu.memory_space<vmem>>, vector<1x4x8x8xf32>
    %27 = vector.shape_cast %26 : vector<1x4x8x8xf32> to vector<4x8x8xf32>
    %28 = vector.shape_cast %25 : vector<4x8x8xf32> to vector<1x4x8x8xf32>
    tpu.vector_store %arg3[%c0_32, %c0_33, %c0_34, %c0_35], %28 {strides = array<i32>} : memref<1x4x8x8xf32, #tpu.memory_space<vmem>>, vector<1x4x8x8xf32>,
    return
  }
  func.func @transform_0(%arg0: i32, %arg1: i32) -> (i32, i32, i32, i32) {
    %c0_i32 = arith.constant 0 : i32
    %c0_i32_0 = arith.constant 0 : i32
    %c0_i32_1 = arith.constant 0 : i32
    return %arg0, %arg1, %c0_i32, %c0_i32_0 : i32, i32, i32, i32
  }
  func.func @transform_1(%arg0: i32, %arg1: i32) -> (i32, i32, i32, i32) {
    %c0_i32 = arith.constant 0 : i32
    %c0_i32_0 = arith.constant 0 : i32
    %c0_i32_1 = arith.constant 0 : i32
    return %arg0, %arg1, %c0_i32, %c0_i32_0 : i32, i32, i32, i32
  }
}

</mosaic_0001>

<bundles_post_ra>
// kernel: maxpool.1
= control target key start
LH: loop header
LB: loop body
LE: loop exit
PB: predicated region body
PF: predicated region fallthrough
CT: control target
= control target key end

     0   :  { %6 = vsyncpa [#allocation4], 0  ;;  %s1037_s0 = inlined_call_operand.hbm [shape: f32[2,4,16,16], index: 0, kind: input, shape index: {}]   ;;  %s1038_s1 = inlined_call_operand.hbm [shape: f32[2,4,8,8], index: 1, kind: output, shape index: {}]  }
   0x1   :  { %8 = vsyncpa [#allocation4 + $0x1], 0 }
   0x2   :  { %9 = vsyncpa [#allocation5], 0 }
   0x3   :  { %11 = vsyncpa [#allocation5 + $0x1], 0  ;;  %s852_s6 = smov 0   ;;  %s854_s7 = smov 0  }
   0x4   :  { %s856_s8 = smov 0   ;;  %s858_s9 = smov 0  }
   0x5   :  { %s860_s10 = smov 0   ;;  %s862_s11 = smov 0  }
   0x6 LB: > { %s629_s12 = sadd.s32 4294967295, %s833_s11   ;;  %s630_s13 = sadd.s32 4294967294, %s833_s11   ;;  %s833_s11 = sphi %s862_s11, %s17_s11   ;;  %s829_s10 = sphi %s860_s10, %s1049_s10   ;;  %s825_s9 = sphi %s858_s9, %s1048_s9   ;;  %s821_s8 = sphi %s856_s8, %s1047_s8   ;;  %s817_s7 = sphi %s854_s7, %s1046_s7   ;;  %s813_s6 = sphi %s852_s6, %s1045_s6  }
   0x7   : > { %s29_s14 = sadd.s32 1, %s829_s10  ;;  %s38_s15 = sadd.s32 1, %s821_s8 }
   0x8   : > { %p31_p0 = scmp.ge.s32.totalorder %s29_s14, 2  ;;  %p45_p1 = scmp.ne.s32.totalorder %s821_s8, %s817_s7 }
   0x9   : > { %p46_p2 = scmp.eq.s32.totalorder %s833_s11, 0  ;;  %p51_p3 = scmp.ne.s32.totalorder %s817_s7, %s813_s6 }
   0xa   : > { %s1051_s14 = smov (%p31_p0, %s29_s14), 0  ;;  %p52_p5 = scmp.eq.s32.totalorder %s629_s12, 0 }
   0xb   : > { %p893_p4 = por %p46_p2, %p45_p1  ;;  %s33_s17 = ssub.s32 %s829_s10, %s1051_s14 }
   0xc   : > { %p77_p6 = scmp.eq.s32.totalorder %s629_s12, 1  ;;  %p36_p7 = scmp.eq.s32.totalorder %s33_s17, 0 }
   0xd   : > { %p899_p8 = por %p52_p5, %p51_p3  ;;  %p83_p10 = scmp.eq.s32.totalorder %s630_s13, 1 }
   0xe   : > { %p903_p9 = por %p77_p6, %p45_p1  ;;  %p670_p13 = scmp.lt.s32.totalorder %s833_s11, 2 }
   0xf   : > { %s908_s20 = scalar_select %p36_p7, %s821_s8, %s38_s15  }
  0x10   : > { %p910_p11 = por %p83_p10, %p51_p3  ;;  %s103_s22 = sand.u32 1, %s821_s8  }
  0x11   : > { %s633_s23 = sshll.u32 %s103_s22, 6  ;;  %s656_s24 = sshll.u32 %s829_s10, 10 }
  0x12   : > { %s116_s27 = scalar_lea.hbm %s1037_s0, %s656_s24  ;;  %s107_s28 = scalar_lea.vmem [#allocation3], %s633_s23 }
  0x13   : > { %s117_s29 = sshll.u32 %s107_s28, 4  ;;  %p923_p0 = pnand %p670_p13, %p893_p4  ;;  %s118_s29 = int_to_ptr.vmem [resolvable:$true] %s117_s29 }
  0x14   : > { %p636_p1 = scmp.ge.s32.totalorder %s833_s11, 1  ;;  %s104_s2 = scalar_lea.sflag [#allocation4], %s103_s22 }
  0x15   : > { %p727_p2 = pneg %p923_p0  ;;  %s738_s3 = scalar_lea.vmem %s118_s29, 1024 }
  0x16   : > { %p739_p3 = scmp.ne.s32.totalorder %s118_s29, %s738_s3  ;;  %s835_s4 = smov [#allocation3]  }
  0x17   : > { %s743_s5 = sshll.u32 %s835_s4, 4  ;;  %s744_s5 = int_to_ptr.vmem [resolvable:$false] %s743_s5 }
  0x18   : > { %p741_p5 = pnand %p739_p3, %p727_p2  ;;  %s745_s12 = scalar_lea.vmem %s744_s5, 2048 }
  0x19   : > { %p746_p7 = scmp.lt.s32.totalorder %s118_s29, %s744_s5  ;;  %p747_p10 = scmp.lt.s32.totalorder %s745_s12, %s738_s3 }
  0x1a   : > { %p742_p6 = pneg %p741_p5 }
  0x1b   : > { %p748_p12 = por %p747_p10, %p746_p7 }
  0x1d   : > { %p749_p4 = pnand %p748_p12, %p742_p6 }
  0x1f   : > { %752 = shalt.err (!%p749_p4)
}
  0x20   : > { %s836_s13 = smov 128   ;;  %s837_s15 = smov 8  }
  0x21   : > { %665 = dma.hbm_to_vmem [thread:$0]  (!%p923_p0), %s116_s27, 1024, %s118_s29, %s104_s2, %s836_s13, %s836_s13, %s837_s15  }
  0x22   : > { %p125_p13 = scmp.lt.s32.totalorder %s833_s11, 3 }
  0x24   : > { %p126_p2 = pnand %p636_p1, %p125_p13 }
  0x25   : > { %s936_s16 = sand.u32 (!%p126_p2), 1, %s817_s7  }
  0x26   : > { %129 = sbr.rel (%p126_p2) target bundleno = 348 (0x15c), region = 24  ;;  %s637_s17 = sshll.u32 (!%p126_p2), %s936_s16, 6 }
  0x27   : > { %s132_s22 = scalar_lea.sflag (!%p126_p2), [#allocation4], %s936_s16  ;;  %s940_s23 = scalar_lea.vmem (!%p126_p2), [#allocation3], %s637_s17 }
  0x2b   : > { %804 = dma.done.wait (%p899_p8), %s132_s22, 1024  }
  0x2c   : > { %806 = vsyncadd (%p899_p8), %s132_s22, 4294966272  ;;  %v158_v0 = vld [vmem:[%s940_s23 + $0x20] sm:$0x1]  ;;  %v162_v1 = vld [vmem:[%s940_s23 + $0x21] sm:$0x1]  ;;  %vm216_vm0 = vcmask 1040384  }
  0x2d   : > { %v156_v2 = vld [vmem:[%s940_s23] sm:$0x1]  ;;  %v166_v3 = vmax.f32 %v158_v0, %v162_v1  ;;  %v641_v4 = vld [vmem:[%s940_s23 + $0x21] ss:$2 sm:$0x7f]  ;;  %vm358_vm1 = vcmask 57344  }
  0x2e   : > { %v645_v5 = vld [vmem:[%s940_s23 + $0x22] ss:$2 sm:$0x7f]  ;;  %v649_v7 = vld [vmem:[%s940_s23 + $0x23] ss:$2 sm:$0x7f] }
  0x2f   : > { %v190_v6 = vmax.f32 %v641_v4, %v645_v5  ;;  %v160_v8 = vld [vmem:[%s940_s23 + $0x1] sm:$0x1]  ;;  %v170_v9 = vmax.f32 %v166_v3, 0.0  ;;  %v159_v12 = vld [vmem:[%s940_s23 + $0x30] sm:$0x1]  ;;  %v838_v42 = vmov 0.0  }
  0x30   : > { %v164_v10 = vmax.f32 %v156_v2, %v160_v8  ;;  %v639_v11 = vld [vmem:[%s940_s23 + $0x1] ss:$2 sm:$0x7f]  ;;  %v643_v14 = vld [vmem:[%s940_s23 + $0x2] ss:$2 sm:$0x7f] }
  0x31   : > { %v202_v13 = vmax.f32 %v190_v6, %v649_v7  ;;  %v647_v15 = vld [vmem:[%s940_s23 + $0x3] ss:$2 sm:$0x7f]  ;;  %v188_v16 = vmax.f32 %v639_v11, %v643_v14  ;;  %v163_v17 = vld [vmem:[%s940_s23 + $0x31] sm:$0x1]  ;;  %vm349_vm2 = vcmask 64512  }
  0x32   : > { %v642_v18 = vld [vmem:[%s940_s23 + $0x31] ss:$2 sm:$0x7f]  ;;  %v167_v20 = vmax.f32 %v159_v12, %v163_v17  ;;  %v646_v21 = vld [vmem:[%s940_s23 + $0x32] ss:$2 sm:$0x7f] }
  0x33   : > { %v210_v19 = vrot.slane %v202_v13, 7  ;;  %v157_v22 = vld [vmem:[%s940_s23 + $0x10] sm:$0x1]  ;;  %v168_v23 = vmax.f32 %v164_v10, 0.0  ;;  %v200_v24 = vmax.f32 %v188_v16, %v647_v15  ;;  %v191_v25 = vmax.f32 %v642_v18, %v646_v21  ;;  %v161_v27 = vld [vmem:[%s940_s23 + $0x11] sm:$0x1] }
  0x34   : > { %v650_v26 = vld [vmem:[%s940_s23 + $0x33] ss:$2 sm:$0x7f]  ;;  %v165_v29 = vmax.f32 %v157_v22, %v161_v27  ;;  %v171_v32 = vmax.f32 %v167_v20, 0.0  ;;  %359 = vst.msk [vmem:[#allocation2] sm:$0x1] %vm358_vm1, %v838_v42 }
  0x35   : > { %v219_v28 = vsel %vm216_vm0, %v170_v9, %v210_v19  ;;  %v640_v30 = vld [vmem:[%s940_s23 + $0x11] ss:$2 sm:$0x7f]  ;;  %v208_v31 = vrot.slane %v200_v24, 7  ;;  %v203_v33 = vmax.f32 %v191_v25, %v650_v26  ;;  %360 = vst.msk [vmem:[#allocation2 + $0x18] sm:$0x1] %vm358_vm1, %v838_v42 }
  0x36   : > { %285 = vxpose.xlu1.b32.start.end [1/1] (short) (narrow) %v219_v28, 16  ;;  %v644_v34 = vld [vmem:[%s940_s23 + $0x12] ss:$2 sm:$0x7f]  ;;  %v169_v39 = vmax.f32 %v165_v29, 0.0  ;;  %s638_s18 = sshll.u32 %s936_s16, 5 }
  0x37   : > { %v189_v35 = vmax.f32 %v640_v30, %v644_v34  ;;  %v648_v36 = vld [vmem:[%s940_s23 + $0x13] ss:$2 sm:$0x7f]  ;;  %v217_v37 = vsel %vm216_vm0, %v168_v23, %v208_v31  ;;  %v211_v38 = vrot.slane %v203_v33, 7  ;;  %361 = vst.msk [vmem:[#allocation2 + $0x30] sm:$0x1] %vm358_vm1, %v838_v42 }
  0x38   : > { %221 = vxpose.xlu0.b32.start.end [1/1] (short) (narrow) %v217_v37, 16  ;;  %362 = vst.msk [vmem:[#allocation2 + $0x48] sm:$0x1] %vm358_vm1, %v838_v42  ;;  %s153_s24 = scalar_lea.vmem [#allocation6], %s638_s18  ;;  %s657_s26 = sshll.u32 %s825_s9, 9 }
  0x39   : > { %v201_v40 = vmax.f32 %v189_v35, %v648_v36  ;;  %v220_v41 = vsel %vm216_vm0, %v171_v32, %v211_v38  ;;  %s542_s25 = sshll.u32 %s153_s24, 4  ;;  %s988_s29 = scalar_lea.hbm %s1038_s1, %s657_s26  ;;  %s982_s25 = int_to_ptr.vmem [resolvable:$true] %s542_s25 }
  0x3a   : > { %s527_s30 = scalar_lea.sflag [#allocation5], %s936_s16  ;;  %s753_s2 = scalar_lea.vmem %s982_s25, 512 }
  0x3b   : > { %317 = vxpose.xlu1.b32.start.end [1/1] (short) (narrow) %v220_v41, 16  ;;  %v209_v43 = vrot.slane %v201_v40, 7  ;;  %p754_p8 = scmp.ne.s32.totalorder %s982_s25, %s753_s2  ;;  %s839_s9 = smov [#allocation6]  }
  0x3c   : > { %s757_s3 = sshll.u32 %s839_s9, 4  ;;  %s758_s3 = int_to_ptr.vmem [resolvable:$false] %s757_s3 }
  0x3d   : > { %v218_v44 = vsel %vm216_vm0, %v169_v39, %v209_v43  ;;  %p755_p12 = pnand %p754_p8, %p903_p9  ;;  %s759_s4 = scalar_lea.vmem %s758_s3, 1024 }
  0x3e   : > { %253 = vxpose.xlu0.b32.start.end [1/1] (short) (narrow) %v218_v44, 16  ;;  %p760_p1 = scmp.lt.s32.totalorder %s982_s25, %s758_s3  ;;  %p761_p3 = scmp.lt.s32.totalorder %s759_s4, %s753_s2 }
  0x3f   : > { %p756_p0 = pneg %p755_p12 }
  0x40   : > { %p762_p5 = por %p761_p3, %p760_p1 }
  0x42   : > { %p763_p6 = pnand %p762_p5, %p756_p0 }
  0xb2   : > { %v301_v45 = vpop.trf.xlu1 }
  0xb3   : > { %354 = vst.msk [vmem:[#allocation2 + $0x31] sm:$0xff] %vm349_vm2, %v301_v45 }
  0xb4   : > { %v237_v46 = vpop.trf.xlu0 }
  0xb5   : > { %350 = vst.msk [vmem:[#allocation2 + $0x1] sm:$0xff] %vm349_vm2, %v237_v46 }
  0xb6   : > { %v302_v47 = vpop.trf.xlu1 }
  0xb7   : > { %355 = vst.msk [vmem:[#allocation2 + $0x39] sm:$0xff] %vm349_vm2, %v302_v47 }
  0xb8   : > { %v238_v48 = vpop.trf.xlu0 }
  0xb9   : > { %351 = vst.msk [vmem:[#allocation2 + $0x9] sm:$0xff] %vm349_vm2, %v238_v48 }
  0xba   : > { %v333_v49 = vpop.trf.xlu1 }
  0xbb   : > { %356 = vst.msk [vmem:[#allocation2 + $0x49] sm:$0xff] %vm349_vm2, %v333_v49 }
  0xbc   : > { %v269_v50 = vpop.trf.xlu0 }
  0xbd   : > { %352 = vst.msk [vmem:[#allocation2 + $0x19] sm:$0xff] %vm349_vm2, %v269_v50 }
  0xbe   : > { %v334_v51 = vpop.trf.xlu1  ;;  %v367_v52 = vld [vmem:[#allocation2 + $0x30] ss:$2 sm:$0xff]  ;;  %v375_v56 = vld [vmem:[#allocation2 + $0x31] ss:$2 sm:$0xff] }
  0xbf   : > { %357 = vst.msk [vmem:[#allocation2 + $0x51] sm:$0xff] %vm349_vm2, %v334_v51  ;;  %v380_v60 = vmax.f32 %v367_v52, %v375_v56  ;;  %v387_v61 = vld [vmem:[#allocation2 + $0x32] ss:$2 sm:$0xff] }
  0xc0   : > { %v270_v53 = vpop.trf.xlu0  ;;  %v363_v54 = vld [vmem:[#allocation2] ss:$2 sm:$0xff]  ;;  %v371_v55 = vld [vmem:[#allocation2 + $0x1] ss:$2 sm:$0xff] }
  0xc1   : > { %353 = vst.msk [vmem:[#allocation2 + $0x21] sm:$0xff] %vm349_vm2, %v270_v53  ;;  %v378_v57 = vmax.f32 %v363_v54, %v371_v55  ;;  %v383_v58 = vld [vmem:[#allocation2 + $0x2] ss:$2 sm:$0xff]  ;;  %v392_v62 = vmax.f32 %v380_v60, %v387_v61 }
  0xc3   : > { %v390_v59 = vmax.f32 %v378_v57, %v383_v58 }
  0xc5   : > { %394 = vxpose.xlu0.b32.start.end [1/1] (short) (narrow) %v390_v59, 8 }
  0xc6   : > { %v369_v63 = vld [vmem:[#allocation2 + $0x48] ss:$2 sm:$0xff]  ;;  %v377_v2 = vld [vmem:[#allocation2 + $0x49] ss:$2 sm:$0xff] }
  0xc7   : > { %v381_v6 = vmax.f32 %v369_v63, %v377_v2  ;;  %v389_v7 = vld [vmem:[#allocation2 + $0x4a] ss:$2 sm:$0xff] }
  0xc8   : > { %v365_v0 = vld [vmem:[#allocation2 + $0x18] ss:$2 sm:$0xff]  ;;  %v373_v1 = vld [vmem:[#allocation2 + $0x19] ss:$2 sm:$0xff] }
  0xc9   : > { %458 = vxpose.xlu0.b32.start.end [1/1] (short) (narrow) %v392_v62, 8  ;;  %v379_v3 = vmax.f32 %v365_v0, %v373_v1  ;;  %v385_v4 = vld [vmem:[#allocation2 + $0x1a] ss:$2 sm:$0xff]  ;;  %v393_v8 = vmax.f32 %v381_v6, %v389_v7 }
  0xcb   : > { %v391_v5 = vmax.f32 %v379_v3, %v385_v4 }
  0xcd   : > { %426 = vxpose.xlu1.b32.start.end [1/1] (short) (narrow) %v391_v5, 8 }
  0xd1   : > { %490 = vxpose.xlu1.b32.start.end [1/1] (short) (narrow) %v393_v8, 8 }
 0x141   : > { %v410_v9 = vpop.trf.xlu0 }
 0x142   : > { %522 = vst.msk [vmem:[%s153_s24] sm:$0xff] %vm349_vm2, %v410_v9 }
 0x145   : > { %v474_v10 = vpop.trf.xlu0 }
 0x146   : > { %524 = vst.msk [vmem:[%s153_s24 + $0x10] sm:$0xff] %vm349_vm2, %v474_v10 }
 0x149   : > { %v442_v11 = vpop.trf.xlu1 }
 0x14a   : > { %523 = vst.msk [vmem:[%s153_s24 + $0x8] sm:$0xff] %vm349_vm2, %v442_v11 }
 0x14d   : > { %v506_v12 = vpop.trf.xlu1 }
 0x14e   : > { %525 = vst.msk [vmem:[%s153_s24 + $0x18] sm:$0xff] %vm349_vm2, %v506_v12 }
 0x14f   : > { %766 = shalt.err (!%p763_p6)
}
 0x150   : > { %s767_s5 = scalar_lea.hbm %s988_s29, 512  ;;  %s771_s15 = scalar_lea.hbm %s1038_s1, 1024 }
 0x151   : > { %p768_p7 = scmp.ne.s32.totalorder %s988_s29, %s767_s5  ;;  %p772_p13 = scmp.lt.s32.totalorder %s988_s29, %s1038_s1 }
 0x152   : > { %p773_p2 = scmp.lt.s32.totalorder %s771_s15, %s767_s5 }
 0x153   : > { %p769_p10 = pnand %p768_p7, %p903_p9 }
 0x154   : > { %p774_p8 = por %p773_p2, %p772_p13 }
 0x155   : > { %p770_p4 = pneg %p769_p10 }
 0x157   : > { %p775_p12 = pnand %p774_p8, %p770_p4 }
 0x159   : > { %778 = shalt.err (!%p775_p12)
}
 0x15a   : > { %s840_s23 = smov 128   ;;  %s841_s18 = smov 8  }
 0x15b   : > { %660 = dma.vmem_to_hbm [thread:$0]  (%p903_p9), %s982_s25, 512, %s988_s29, %s527_s30, %s840_s23, %s840_s23, %s841_s18  }
 0x15c PF: > { %s557_s24 = sand.u32 1, %s813_s6   ;;  %p1044_p0 = scmp.ge.s32.totalorder %s833_s11, 2 }
 0x15d   : > { %s558_s26 = scalar_lea.sflag [#allocation5], %s557_s24 }
 0x15e   : > { %p667_p1 = pnand %p1044_p0, %p910_p11 }
 0x160   : > { %p668_p3 = pneg %p667_p1 }
 0x162   : > { %808 = dma.done.wait (%p668_p3), %s558_s26, 512  }
 0x163   : > { %810 = vsyncadd (%p668_p3), %s558_s26, 4294966784  ;;  %s17_s11 = sadd.s32 1, %s833_s11   ;;  %s1045_s6 = smov %s817_s7 }
 0x164   : > { %p14_p5 = scmp.ge.s32.totalorder %s17_s11, 4   ;;  %s1046_s7 = smov %s821_s8 }
 0x165   : > { %s1047_s8 = smov %s908_s20  ;;  %s1048_s9 = smov %s829_s10 }
 0x166   : > { %s1049_s10 = smov %s1051_s14  ;;  %16 = sbr.rel (!%p14_p5) target bundleno = 6 (0x6), region = 92 }
 0x16b   :  { %563 = vsyncpa [#allocation4], 1 }
 0x16c   :  { %565 = vsyncpa [#allocation4 + $0x1], 1 }
 0x16d   :  { %566 = vsyncpa [#allocation5], 1 }
 0x16e   :  { %568 = vsyncpa [#allocation5 + $0x1], 1 }

</bundles_post_ra>
